<compile_context>
chip_gen: v7x
topology: tpu7x:2x2x1
jax: 0.10.0
libtpu: 0.0.40
codegen_flags: <defaults>
</compile_context>

<pallas_src>
import math

import jax
import jax.numpy as jnp
from jax.experimental import pallas as pl
from jax.experimental.pallas import tpu as pltpu

WIN_SIZE = 11
SIGMA = 1.5
C1 = 0.01 ** 2
C2 = 0.03 ** 2


def _gauss_1d(size=WIN_SIZE, sigma=SIGMA):
    # Same 1-D profile as fspecial_gauss (normalized Gaussian at integer offsets).
    coords = jnp.arange(size, dtype=jnp.float32) - (size // 2)
    g = jnp.exp(-(coords ** 2) / (2.0 * sigma ** 2))
    return g / jnp.sum(g)


def _conv_matrix(in_len, win=WIN_SIZE):
    # A[i, i:i+win] = g1d, so (A @ v) is the 'valid' 1-D Gaussian correlation.
    g = _gauss_1d(win)
    out_len = in_len - win + 1
    i = jnp.arange(out_len, dtype=jnp.int32)[:, None]
    j = jnp.arange(in_len, dtype=jnp.int32)[None, :]
    k = j - i
    valid = (k >= 0) & (k < win)
    vals = jnp.take(g, jnp.clip(k, 0, win - 1))
    return jnp.where(valid, vals, 0.0).astype(jnp.float32)   # (out_len, in_len)


def _make_ssim_kernel(Bp, H, W, Ho, Wo, matmul_dtype):
    """Kernel closure over static sizes.

    x_ref, y_ref : (Bp*H, W)  Bp image planes, plane b at rows [b*H, (b+1)*H)
    a_ref        : (Ho, H)    row-conv band matrix (shared, grid-invariant)
    bt_ref       : (W, Wo)    column-conv band matrix, transposed (grid-invariant)
    out_ref      : (Bp, 1, 1) per-plane sums of ssim_map
    """

    def kernel(x_ref, y_ref, a_ref, bt_ref, out_ref):
        x = x_ref[...]                                   # (Bp*H, W) f32
        y = y_ref[...]
        a = a_ref[...].astype(matmul_dtype)              # (Ho, H)
        bt = bt_ref[...].astype(matmul_dtype)            # (W, Wo)

        # Column conv with all Bp planes folded into the matmul M dimension.
        def colconv(q):
            return jnp.dot(q.astype(matmul_dtype), bt,
                           preferred_element_type=jnp.float32)   # (Bp*H, Wo)

        tx = colconv(x)
        ty = colconv(y)
        txx = colconv(x * x)
        tyy = colconv(y * y)
        txy = colconv(x * y)

        # Row conv + SSIM epilogue, statically unrolled over the Bp planes.
        for b in range(Bp):
            s = b * H

            def rowconv(t):
                return jnp.dot(a, t[s:s + H, :].astype(matmul_dtype),
                               preferred_element_type=jnp.float32)  # (Ho, Wo)

            mu1 = rowconv(tx)
            mu2 = rowconv(ty)
            ex2 = rowconv(txx)
            ey2 = rowconv(tyy)
            exy = rowconv(txy)

            mu1_sq = mu1 * mu1
            mu2_sq = mu2 * mu2
            mu1_mu2 = mu1 * mu2
            sigma1_sq = ex2 - mu1_sq
            sigma2_sq = ey2 - mu2_sq
            sigma12 = exy - mu1_mu2

            # Fused form of:
            #   cs   = relu((2*s12 + C2) / (s1 + s2 + C2))
            #   ssim = (2*mu1mu2 + C1) / (mu1^2 + mu2^2 + C1) * cs
            # (both denominators are strictly positive so the relu commutes)
            num = (2.0 * mu1_mu2 + C1) * jnp.maximum(2.0 * sigma12 + C2, 0.0)
            den = (mu1_sq + mu2_sq + C1) * (sigma1_sq + sigma2_sq + C2)
            ssim_map = num * pl.reciprocal(den, approx=True)      # EUP slot

            out_ref[b, :, :] = jnp.sum(ssim_map, keepdims=True)   # (1, 1)

    return kernel


def ssim_loss(X, Y, *, matmul_dtype=jnp.float32):
    """SSIM forward with as_loss=True: returns 1 - mean(ssim_val)."""
    assert X.shape == Y.shape and X.ndim == 4
    N, C, H, W = X.shape
    assert H >= WIN_SIZE and W >= WIN_SIZE, "SSIM needs H, W >= 11"
    Ho = H - WIN_SIZE + 1
    Wo = W - WIN_SIZE + 1
    NC = N * C

    # ---- plane-batch (Bp) selection --------------------------------------
    # (a) Bp*H must be a multiple of 8 (sublane tiling of the (Bp*H, W) block).
    sub = 8 // math.gcd(H, 8)
    # (b) keep the per-step working set ~<= 20 MiB so it fits comfortably
    #     under the 32 MiB scoped-VMEM limit requested below (safe for v5e's
    #     smaller default and for v7x's 64 MiB physical VMEM).
    bytes_per_plane = (4 * H * W + 3 * H * W + 5 * H * Wo) * 4
    budget = 20 * 1024 * 1024
    bp = max(1, min(16, budget // max(bytes_per_plane, 1)))
    if NC >= 2:
        bp = min(bp, max(1, NC // 2))        # keep >= 2 grid steps for megacore
    Bp = max(sub, ((bp + sub - 1) // sub) * sub)
    G = -(-NC // Bp)                          # grid steps
    NCp = G * Bp                              # padded plane count

    # ---- host-side data prep ---------------------------------------------
    xs = X.reshape(NC, H, W).astype(jnp.float32)
    ys = Y.reshape(NC, H, W).astype(jnp.float32)
    if NCp > NC:
        pad = ((0, NCp - NC), (0, 0), (0, 0))
        xs = jnp.pad(xs, pad)
        ys = jnp.pad(ys, pad)
    xs2 = xs.reshape(NCp * H, W)              # plane b at rows [b*H, (b+1)*H)
    ys2 = ys.reshape(NCp * H, W)

    A = _conv_matrix(H)                       # (Ho, H)
    Bt = _conv_matrix(W).T                    # (W, Wo)

    kernel = _make_ssim_kernel(Bp, H, W, Ho, Wo, matmul_dtype)

    flops = NCp * (10 * H * W * Wo + 10 * Ho * H * Wo + 15 * Ho * Wo)
    bytes_accessed = (2 * NCp * H * W + Ho * H + W * Wo + NCp) * 4

    partial = pl.pallas_call(
        kernel,
        out_shape=jax.ShapeDtypeStruct((NCp, 1, 1), jnp.float32),
        grid_spec=pltpu.PrefetchScalarGridSpec(
            num_scalar_prefetch=0,
            grid=(G,),
            in_specs=[
                pl.BlockSpec((Bp * H, W), lambda i: (i, 0)),
                pl.BlockSpec((Bp * H, W), lambda i: (i, 0)),
                # Grid-invariant filter matrices: constant index_map -> fetched once.
                pl.BlockSpec((Ho, H), lambda i: (0, 0)),
                pl.BlockSpec((W, Wo), lambda i: (0, 0)),
            ],
            out_specs=pl.BlockSpec((Bp, 1, 1), lambda i: (i, 0, 0)),
        ),
        compiler_params=pltpu.CompilerParams(
            dimension_semantics=("parallel",),
            vmem_limit_bytes=32 * 1024 * 1024),
        cost_estimate=pl.CostEstimate(
            flops=flops, transcendentals=NCp * Ho * Wo,
            bytes_accessed=bytes_accessed),
    )(xs2, ys2, A, Bt)

    # ssim_val = ssim_map.mean([1,2,3]); score = 1 - ssim_val.mean().
    # Equal element counts per batch entry -> mean of per-batch means == global mean.
    mean_ssim = jnp.sum(partial[:NC, 0, 0]) / (NC * Ho * Wo)
    return 1.0 - mean_ssim


def _ssim_loss_ref(X, Y):
    """Pure-JAX reference (written the PyTorch way: two divisions + relu)."""
    N, C, H, W = X.shape
    A = _conv_matrix(H)          # (Ho, H)
    Bt = _conv_matrix(W).T       # (W, Wo)
    X = X.astype(jnp.float32)
    Y = Y.astype(jnp.float32)

    def gfilt(img):
        t = jnp.einsum('oh,nchw->ncow', A, img)
        return jnp.einsum('ncow,wp->ncop', t, Bt)

    mu1 = gfilt(X)
    mu2 = gfilt(Y)
    mu1_sq, mu2_sq, mu1_mu2 = mu1 ** 2, mu2 ** 2, mu1 * mu2
    s1 = gfilt(X * X) - mu1_sq
    s2 = gfilt(Y * Y) - mu2_sq
    s12 = gfilt(X * Y) - mu1_mu2
    cs = jnp.maximum((2 * s12 + C2) / (s1 + s2 + C2), 0.0)
    smap = (2 * mu1_mu2 + C1) / (mu1_sq + mu2_sq + C1) * cs
    return 1.0 - smap.mean(axis=(1, 2, 3)).mean()


if __name__ == "__main__":
    key = jax.random.PRNGKey(0)
    kx, ky = jax.random.split(key)
    N, Cc, H, W = 2, 3, 16, 16
    X = jax.random.uniform(kx, (N, Cc, H, W), dtype=jnp.float32)
    Y = jax.random.uniform(ky, (N, Cc, H, W), dtype=jnp.float32)

    loss = ssim_loss(X, Y)
    jax.block_until_ready(loss)

    ref = _ssim_loss_ref(X, Y)
    assert abs(float(loss) - float(ref)) < 1e-3, (float(loss), float(ref))
    print("KERNEL_OK")
</pallas_src>

<mosaic_0001>
module attributes {stable_mosaic.version = 11 : i64} {
  func.func @kernel(%arg0: i32, %arg1: memref<48x16xf32, #tpu.memory_space<vmem>>, %arg2: memref<48x16xf32, #tpu.memory_space<vmem>>, %arg3: memref<6x16xf32, #tpu.memory_space<vmem>>, %arg4: memref<16x6xf32, #tpu.memory_space<vmem>>, %arg5: memref<3x1x1xf32, #tpu.memory_space<vmem>>) attributes {dimension_semantics = [#tpu.dimension_semantics<parallel>], iteration_bounds = array<i64: 2>, scalar_prefetch = 0 : i64, scratch_operands = 0 : i64, tpu.core_type = #tpu.core_type<tc>, window_params = [{transform_indices = @transform_0, window_bounds = array<i64: 48, 16>}, {transform_indices = @transform_1, window_bounds = array<i64: 48, 16>}, {pipeline_mode = #tpu.pipeline_mode<synchronous>, transform_indices = @transform_2, window_bounds = array<i64: 6, 16>}, {pipeline_mode = #tpu.pipeline_mode<synchronous>, transform_indices = @transform_3, window_bounds = array<i64: 16, 6>}, {transform_indices = @transform_4, window_bounds = array<i64: 3, 1, 1>}]} {
    %c0 = arith.constant 0 : index
    %c0_0 = arith.constant 0 : index
    %0 = vector.load %arg1[%c0, %c0_0] : memref<48x16xf32, #tpu.memory_space<vmem>>, vector<48x16xf32>
    %c0_1 = arith.constant 0 : index
    %c0_2 = arith.constant 0 : index
    %1 = vector.load %arg2[%c0_1, %c0_2] : memref<48x16xf32, #tpu.memory_space<vmem>>, vector<48x16xf32>
    %c0_3 = arith.constant 0 : index
    %c0_4 = arith.constant 0 : index
    %2 = vector.load %arg3[%c0_3, %c0_4] : memref<6x16xf32, #tpu.memory_space<vmem>>, vector<6x16xf32>
    %c0_5 = arith.constant 0 : index
    %c0_6 = arith.constant 0 : index
    %3 = vector.load %arg4[%c0_5, %c0_6] : memref<16x6xf32, #tpu.memory_space<vmem>>, vector<16x6xf32>
    %cst = arith.constant dense<0.000000e+00> : vector<48x6xf32>
    %4 = tpu.matmul %0, %3, %cst {dimension_numbers = #tpu.dot_dimension_numbers<[1], [0], [0], [1], [0, 0, 1, 1], [], []>} : vector<48x16xf32>, vector<16x6xf32>, vector<48x6xf32> -> vector<48x6xf32>
    %cst_7 = arith.constant dense<0.000000e+00> : vector<48x6xf32>
    %5 = tpu.matmul %1, %3, %cst_7 {dimension_numbers = #tpu.dot_dimension_numbers<[1], [0], [0], [1], [0, 0, 1, 1], [], []>} : vector<48x16xf32>, vector<16x6xf32>, vector<48x6xf32> -> vector<48x6xf32>
    %6 = arith.mulf %0, %0 : vector<48x16xf32>
    %cst_8 = arith.constant dense<0.000000e+00> : vector<48x6xf32>
    %7 = tpu.matmul %6, %3, %cst_8 {dimension_numbers = #tpu.dot_dimension_numbers<[1], [0], [0], [1], [0, 0, 1, 1], [], []>} : vector<48x16xf32>, vector<16x6xf32>, vector<48x6xf32> -> vector<48x6xf32>
    %8 = arith.mulf %1, %1 : vector<48x16xf32>
    %cst_9 = arith.constant dense<0.000000e+00> : vector<48x6xf32>
    %9 = tpu.matmul %8, %3, %cst_9 {dimension_numbers = #tpu.dot_dimension_numbers<[1], [0], [0], [1], [0, 0, 1, 1], [], []>} : vector<48x16xf32>, vector<16x6xf32>, vector<48x6xf32> -> vector<48x6xf32>
    %10 = arith.mulf %0, %1 : vector<48x16xf32>
    %cst_10 = arith.constant dense<0.000000e+00> : vector<48x6xf32>
    %11 = tpu.matmul %10, %3, %cst_10 {dimension_numbers = #tpu.dot_dimension_numbers<[1], [0], [0], [1], [0, 0, 1, 1], [], []>} : vector<48x16xf32>, vector<16x6xf32>, vector<48x6xf32> -> vector<48x6xf32>
    %12 = vector.extract_strided_slice %4 {offsets = [0, 0], sizes = [16, 6], strides = [1, 1]} : vector<48x6xf32> to vector<16x6xf32>
    %cst_11 = arith.constant dense<0.000000e+00> : vector<6x6xf32>
    %13 = tpu.matmul %2, %12, %cst_11 {dimension_numbers = #tpu.dot_dimension_numbers<[1], [0], [0], [1], [0, 0, 1, 1], [], []>} : vector<6x16xf32>, vector<16x6xf32>, vector<6x6xf32> -> vector<6x6xf32>
    %14 = vector.extract_strided_slice %5 {offsets = [0, 0], sizes = [16, 6], strides = [1, 1]} : vector<48x6xf32> to vector<16x6xf32>
    %cst_12 = arith.constant dense<0.000000e+00> : vector<6x6xf32>
    %15 = tpu.matmul %2, %14, %cst_12 {dimension_numbers = #tpu.dot_dimension_numbers<[1], [0], [0], [1], [0, 0, 1, 1], [], []>} : vector<6x16xf32>, vector<16x6xf32>, vector<6x6xf32> -> vector<6x6xf32>
    %16 = vector.extract_strided_slice %7 {offsets = [0, 0], sizes = [16, 6], strides = [1, 1]} : vector<48x6xf32> to vector<16x6xf32>
    %cst_13 = arith.constant dense<0.000000e+00> : vector<6x6xf32>
    %17 = tpu.matmul %2, %16, %cst_13 {dimension_numbers = #tpu.dot_dimension_numbers<[1], [0], [0], [1], [0, 0, 1, 1], [], []>} : vector<6x16xf32>, vector<16x6xf32>, vector<6x6xf32> -> vector<6x6xf32>
    %18 = vector.extract_strided_slice %9 {offsets = [0, 0], sizes = [16, 6], strides = [1, 1]} : vector<48x6xf32> to vector<16x6xf32>
    %cst_14 = arith.constant dense<0.000000e+00> : vector<6x6xf32>
    %19 = tpu.matmul %2, %18, %cst_14 {dimension_numbers = #tpu.dot_dimension_numbers<[1], [0], [0], [1], [0, 0, 1, 1], [], []>} : vector<6x16xf32>, vector<16x6xf32>, vector<6x6xf32> -> vector<6x6xf32>
    %20 = vector.extract_strided_slice %11 {offsets = [0, 0], sizes = [16, 6], strides = [1, 1]} : vector<48x6xf32> to vector<16x6xf32>
    %cst_15 = arith.constant dense<0.000000e+00> : vector<6x6xf32>
    %21 = tpu.matmul %2, %20, %cst_15 {dimension_numbers = #tpu.dot_dimension_numbers<[1], [0], [0], [1], [0, 0, 1, 1], [], []>} : vector<6x16xf32>, vector<16x6xf32>, vector<6x6xf32> -> vector<6x6xf32>
    %22 = arith.mulf %13, %13 : vector<6x6xf32>
    %23 = arith.mulf %15, %15 : vector<6x6xf32>
    %24 = arith.mulf %13, %15 : vector<6x6xf32>
    %25 = arith.subf %17, %22 : vector<6x6xf32>
    %26 = arith.subf %19, %23 : vector<6x6xf32>
    %27 = arith.subf %21, %24 : vector<6x6xf32>
    %cst_16 = arith.constant 2.000000e+00 : f32
    %28 = vector.broadcast %cst_16 : f32 to vector<6x6xf32>
    %29 = arith.mulf %28, %24 : vector<6x6xf32>
    %cst_17 = arith.constant 9.99999974E-5 : f32
    %30 = vector.broadcast %cst_17 : f32 to vector<6x6xf32>
    %31 = arith.addf %29, %30 : vector<6x6xf32>
    %cst_18 = arith.constant 2.000000e+00 : f32
    %32 = vector.broadcast %cst_18 : f32 to vector<6x6xf32>
    %33 = arith.mulf %32, %27 : vector<6x6xf32>
    %cst_19 = arith.constant 8.99999984E-4 : f32
    %34 = vector.broadcast %cst_19 : f32 to vector<6x6xf32>
    %35 = arith.addf %33, %34 : vector<6x6xf32>
    %cst_20 = arith.constant 0.000000e+00 : f32
    %36 = vector.broadcast %cst_20 : f32 to vector<6x6xf32>
    %37 = arith.maximumf %35, %36 : vector<6x6xf32>
    %38 = arith.mulf %31, %37 : vector<6x6xf32>
    %39 = arith.addf %22, %23 : vector<6x6xf32>
    %cst_21 = arith.constant 9.99999974E-5 : f32
    %40 = vector.broadcast %cst_21 : f32 to vector<6x6xf32>
    %41 = arith.addf %39, %40 : vector<6x6xf32>
    %42 = arith.addf %25, %26 : vector<6x6xf32>
    %cst_22 = arith.constant 8.99999984E-4 : f32
    %43 = vector.broadcast %cst_22 : f32 to vector<6x6xf32>
    %44 = arith.addf %42, %43 : vector<6x6xf32>
    %45 = arith.mulf %41, %44 : vector<6x6xf32>
    %46 = tpu.reciprocal %45 {approx = true} : vector<6x6xf32> -> vector<6x6xf32>
    %47 = arith.mulf %38, %46 : vector<6x6xf32>
    %48 = vector.shape_cast %47 : vector<6x6xf32> to vector<1x6x6xf32>
    %cst_23 = arith.constant dense<0.000000e+00> : vector<1xf32>
    %49 = vector.multi_reduction <add>, %48, %cst_23 [1, 2] : vector<1x6x6xf32> to vector<1xf32>
    %50 = vector.shape_cast %49 : vector<1xf32> to vector<1x1x1xf32>
    %51 = vector.extract %50[0, 0, 0] : f32 from vector<1x1x1xf32>
    %52 = vector.broadcast %51 : f32 to vector<1x1xf32>
    %c0_24 = arith.constant 0 : index
    %c0_25 = arith.constant 0 : index
    %c0_26 = arith.constant 0 : index
    %53 = vector.load %arg5[%c0_24, %c0_25, %c0_26] : memref<3x1x1xf32, #tpu.memory_space<vmem>>, vector<1x1x1xf32>
    %54 = vector.shape_cast %53 : vector<1x1x1xf32> to vector<1x1xf32>
    %55 = vector.shape_cast %52 : vector<1x1xf32> to vector<1x1x1xf32>
    tpu.vector_store %arg5[%c0_24, %c0_25, %c0_26], %55 {strides = array<i32>} : memref<3x1x1xf32, #tpu.memory_space<vmem>>, vector<1x1x1xf32>,
    %56 = vector.extract_strided_slice %4 {offsets = [16, 0], sizes = [16, 6], strides = [1, 1]} : vector<48x6xf32> to vector<16x6xf32>
    %cst_27 = arith.constant dense<0.000000e+00> : vector<6x6xf32>
    %57 = tpu.matmul %2, %56, %cst_27 {dimension_numbers = #tpu.dot_dimension_numbers<[1], [0], [0], [1], [0, 0, 1, 1], [], []>} : vector<6x16xf32>, vector<16x6xf32>, vector<6x6xf32> -> vector<6x6xf32>
    %58 = vector.extract_strided_slice %5 {offsets = [16, 0], sizes = [16, 6], strides = [1, 1]} : vector<48x6xf32> to vector<16x6xf32>
    %cst_28 = arith.constant dense<0.000000e+00> : vector<6x6xf32>
    %59 = tpu.matmul %2, %58, %cst_28 {dimension_numbers = #tpu.dot_dimension_numbers<[1], [0], [0], [1], [0, 0, 1, 1], [], []>} : vector<6x16xf32>, vector<16x6xf32>, vector<6x6xf32> -> vector<6x6xf32>
    %60 = vector.extract_strided_slice %7 {offsets = [16, 0], sizes = [16, 6], strides = [1, 1]} : vector<48x6xf32> to vector<16x6xf32>
    %cst_29 = arith.constant dense<0.000000e+00> : vector<6x6xf32>
    %61 = tpu.matmul %2, %60, %cst_29 {dimension_numbers = #tpu.dot_dimension_numbers<[1], [0], [0], [1], [0, 0, 1, 1], [], []>} : vector<6x16xf32>, vector<16x6xf32>, vector<6x6xf32> -> vector<6x6xf32>
    %62 = vector.extract_strided_slice %9 {offsets = [16, 0], sizes = [16, 6], strides = [1, 1]} : vector<48x6xf32> to vector<16x6xf32>
    %cst_30 = arith.constant dense<0.000000e+00> : vector<6x6xf32>
    %63 = tpu.matmul %2, %62, %cst_30 {dimension_numbers = #tpu.dot_dimension_numbers<[1], [0], [0], [1], [0, 0, 1, 1], [], []>} : vector<6x16xf32>, vector<16x6xf32>, vector<6x6xf32> -> vector<6x6xf32>
    %64 = vector.extract_strided_slice %11 {offsets = [16, 0], sizes = [16, 6], strides = [1, 1]} : vector<48x6xf32> to vector<16x6xf32>
    %cst_31 = arith.constant dense<0.000000e+00> : vector<6x6xf32>
    %65 = tpu.matmul %2, %64, %cst_31 {dimension_numbers = #tpu.dot_dimension_numbers<[1], [0], [0], [1], [0, 0, 1, 1], [], []>} : vector<6x16xf32>, vector<16x6xf32>, vector<6x6xf32> -> vector<6x6xf32>
    %66 = arith.mulf %57, %57 : vector<6x6xf32>
    %67 = arith.mulf %59, %59 : vector<6x6xf32>
    %68 = arith.mulf %57, %59 : vector<6x6xf32>
    %69 = arith.subf %61, %66 : vector<6x6xf32>
    %70 = arith.subf %63, %67 : vector<6x6xf32>
    %71 = arith.subf %65, %68 : vector<6x6xf32>
    %cst_32 = arith.constant 2.000000e+00 : f32
    %72 = vector.broadcast %cst_32 : f32 to vector<6x6xf32>
    %73 = arith.mulf %72, %68 : vector<6x6xf32>
    %cst_33 = arith.constant 9.99999974E-5 : f32
    %74 = vector.broadcast %cst_33 : f32 to vector<6x6xf32>
    %75 = arith.addf %73, %74 : vector<6x6xf32>
    %cst_34 = arith.constant 2.000000e+00 : f32
    %76 = vector.broadcast %cst_34 : f32 to vector<6x6xf32>
    %77 = arith.mulf %76, %71 : vector<6x6xf32>
    %cst_35 = arith.constant 8.99999984E-4 : f32
    %78 = vector.broadcast %cst_35 : f32 to vector<6x6xf32>
    %79 = arith.addf %77, %78 : vector<6x6xf32>
    %cst_36 = arith.constant 0.000000e+00 : f32
    %80 = vector.broadcast %cst_36 : f32 to vector<6x6xf32>
    %81 = arith.maximumf %79, %80 : vector<6x6xf32>
    %82 = arith.mulf %75, %81 : vector<6x6xf32>
    %83 = arith.addf %66, %67 : vector<6x6xf32>
    %cst_37 = arith.constant 9.99999974E-5 : f32
    %84 = vector.broadcast %cst_37 : f32 to vector<6x6xf32>
    %85 = arith.addf %83, %84 : vector<6x6xf32>
    %86 = arith.addf %69, %70 : vector<6x6xf32>
    %cst_38 = arith.constant 8.99999984E-4 : f32
    %87 = vector.broadcast %cst_38 : f32 to vector<6x6xf32>
    %88 = arith.addf %86, %87 : vector<6x6xf32>
    %89 = arith.mulf %85, %88 : vector<6x6xf32>
    %90 = tpu.reciprocal %89 {approx = true} : vector<6x6xf32> -> vector<6x6xf32>
    %91 = arith.mulf %82, %90 : vector<6x6xf32>
    %92 = vector.shape_cast %91 : vector<6x6xf32> to vector<1x6x6xf32>
    %cst_39 = arith.constant dense<0.000000e+00> : vector<1xf32>
    %93 = vector.multi_reduction <add>, %92, %cst_39 [1, 2] : vector<1x6x6xf32> to vector<1xf32>
    %94 = vector.shape_cast %93 : vector<1xf32> to vector<1x1x1xf32>
    %95 = vector.extract %94[0, 0, 0] : f32 from vector<1x1x1xf32>
    %96 = vector.broadcast %95 : f32 to vector<1x1xf32>
    %c1 = arith.constant 1 : index
    %c0_40 = arith.constant 0 : index
    %c0_41 = arith.constant 0 : index
    %97 = vector.load %arg5[%c1, %c0_40, %c0_41] : memref<3x1x1xf32, #tpu.memory_space<vmem>>, vector<1x1x1xf32>
    %98 = vector.shape_cast %97 : vector<1x1x1xf32> to vector<1x1xf32>
    %99 = vector.shape_cast %96 : vector<1x1xf32> to vector<1x1x1xf32>
    tpu.vector_store %arg5[%c1, %c0_40, %c0_41], %99 {strides = array<i32>} : memref<3x1x1xf32, #tpu.memory_space<vmem>>, vector<1x1x1xf32>,
    %100 = vector.extract_strided_slice %4 {offsets = [32, 0], sizes = [16, 6], strides = [1, 1]} : vector<48x6xf32> to vector<16x6xf32>
    %cst_42 = arith.constant dense<0.000000e+00> : vector<6x6xf32>
    %101 = tpu.matmul %2, %100, %cst_42 {dimension_numbers = #tpu.dot_dimension_numbers<[1], [0], [0], [1], [0, 0, 1, 1], [], []>} : vector<6x16xf32>, vector<16x6xf32>, vector<6x6xf32> -> vector<6x6xf32>
    %102 = vector.extract_strided_slice %5 {offsets = [32, 0], sizes = [16, 6], strides = [1, 1]} : vector<48x6xf32> to vector<16x6xf32>
    %cst_43 = arith.constant dense<0.000000e+00> : vector<6x6xf32>
    %103 = tpu.matmul %2, %102, %cst_43 {dimension_numbers = #tpu.dot_dimension_numbers<[1], [0], [0], [1], [0, 0, 1, 1], [], []>} : vector<6x16xf32>, vector<16x6xf32>, vector<6x6xf32> -> vector<6x6xf32>
    %104 = vector.extract_strided_slice %7 {offsets = [32, 0], sizes = [16, 6], strides = [1, 1]} : vector<48x6xf32> to vector<16x6xf32>
    %cst_44 = arith.constant dense<0.000000e+00> : vector<6x6xf32>
    %105 = tpu.matmul %2, %104, %cst_44 {dimension_numbers = #tpu.dot_dimension_numbers<[1], [0], [0], [1], [0, 0, 1, 1], [], []>} : vector<6x16xf32>, vector<16x6xf32>, vector<6x6xf32> -> vector<6x6xf32>
    %106 = vector.extract_strided_slice %9 {offsets = [32, 0], sizes = [16, 6], strides = [1, 1]} : vector<48x6xf32> to vector<16x6xf32>
    %cst_45 = arith.constant dense<0.000000e+00> : vector<6x6xf32>
    %107 = tpu.matmul %2, %106, %cst_45 {dimension_numbers = #tpu.dot_dimension_numbers<[1], [0], [0], [1], [0, 0, 1, 1], [], []>} : vector<6x16xf32>, vector<16x6xf32>, vector<6x6xf32> -> vector<6x6xf32>
    %108 = vector.extract_strided_slice %11 {offsets = [32, 0], sizes = [16, 6], strides = [1, 1]} : vector<48x6xf32> to vector<16x6xf32>
    %cst_46 = arith.constant dense<0.000000e+00> : vector<6x6xf32>
    %109 = tpu.matmul %2, %108, %cst_46 {dimension_numbers = #tpu.dot_dimension_numbers<[1], [0], [0], [1], [0, 0, 1, 1], [], []>} : vector<6x16xf32>, vector<16x6xf32>, vector<6x6xf32> -> vector<6x6xf32>
    %110 = arith.mulf %101, %101 : vector<6x6xf32>
    %111 = arith.mulf %103, %103 : vector<6x6xf32>
    %112 = arith.mulf %101, %103 : vector<6x6xf32>
    %113 = arith.subf %105, %110 : vector<6x6xf32>
    %114 = arith.subf %107, %111 : vector<6x6xf32>
    %115 = arith.subf %109, %112 : vector<6x6xf32>
    %cst_47 = arith.constant 2.000000e+00 : f32
    %116 = vector.broadcast %cst_47 : f32 to vector<6x6xf32>
    %117 = arith.mulf %116, %112 : vector<6x6xf32>
    %cst_48 = arith.constant 9.99999974E-5 : f32
    %118 = vector.broadcast %cst_48 : f32 to vector<6x6xf32>
    %119 = arith.addf %117, %118 : vector<6x6xf32>
    %cst_49 = arith.constant 2.000000e+00 : f32
    %120 = vector.broadcast %cst_49 : f32 to vector<6x6xf32>
    %121 = arith.mulf %120, %115 : vector<6x6xf32>
    %cst_50 = arith.constant 8.99999984E-4 : f32
    %122 = vector.broadcast %cst_50 : f32 to vector<6x6xf32>
    %123 = arith.addf %121, %122 : vector<6x6xf32>
    %cst_51 = arith.constant 0.000000e+00 : f32
    %124 = vector.broadcast %cst_51 : f32 to vector<6x6xf32>
    %125 = arith.maximumf %123, %124 : vector<6x6xf32>
    %126 = arith.mulf %119, %125 : vector<6x6xf32>
    %127 = arith.addf %110, %111 : vector<6x6xf32>
    %cst_52 = arith.constant 9.99999974E-5 : f32
    %128 = vector.broadcast %cst_52 : f32 to vector<6x6xf32>
    %129 = arith.addf %127, %128 : vector<6x6xf32>
    %130 = arith.addf %113, %114 : vector<6x6xf32>
    %cst_53 = arith.constant 8.99999984E-4 : f32
    %131 = vector.broadcast %cst_53 : f32 to vector<6x6xf32>
    %132 = arith.addf %130, %131 : vector<6x6xf32>
    %133 = arith.mulf %129, %132 : vector<6x6xf32>
    %134 = tpu.reciprocal %133 {approx = true} : vector<6x6xf32> -> vector<6x6xf32>
    %135 = arith.mulf %126, %134 : vector<6x6xf32>
    %136 = vector.shape_cast %135 : vector<6x6xf32> to vector<1x6x6xf32>
    %cst_54 = arith.constant dense<0.000000e+00> : vector<1xf32>
    %137 = vector.multi_reduction <add>, %136, %cst_54 [1, 2] : vector<1x6x6xf32> to vector<1xf32>
    %138 = vector.shape_cast %137 : vector<1xf32> to vector<1x1x1xf32>
    %139 = vector.extract %138[0, 0, 0] : f32 from vector<1x1x1xf32>
    %140 = vector.broadcast %139 : f32 to vector<1x1xf32>
    %c2 = arith.constant 2 : index
    %c0_55 = arith.constant 0 : index
    %c0_56 = arith.constant 0 : index
    %141 = vector.load %arg5[%c2, %c0_55, %c0_56] : memref<3x1x1xf32, #tpu.memory_space<vmem>>, vector<1x1x1xf32>
    %142 = vector.shape_cast %141 : vector<1x1x1xf32> to vector<1x1xf32>
    %143 = vector.shape_cast %140 : vector<1x1xf32> to vector<1x1x1xf32>
    tpu.vector_store %arg5[%c2, %c0_55, %c0_56], %143 {strides = array<i32>} : memref<3x1x1xf32, #tpu.memory_space<vmem>>, vector<1x1x1xf32>,
    return
  }
  func.func @transform_0(%arg0: i32) -> (i32, i32) {
    %c0_i32 = arith.constant 0 : i32
    %c0_i32_0 = arith.constant 0 : i32
    return %arg0, %c0_i32 : i32, i32
  }
  func.func @transform_1(%arg0: i32) -> (i32, i32) {
    %c0_i32 = arith.constant 0 : i32
    %c0_i32_0 = arith.constant 0 : i32
    return %arg0, %c0_i32 : i32, i32
  }
  func.func @transform_2(%arg0: i32) -> (i32, i32) {
    %c0_i32 = arith.constant 0 : i32
    %c0_i32_0 = arith.constant 0 : i32
    %c0_i32_1 = arith.constant 0 : i32
    return %c0_i32, %c0_i32_0 : i32, i32
  }
  func.func @transform_3(%arg0: i32) -> (i32, i32) {
    %c0_i32 = arith.constant 0 : i32
    %c0_i32_0 = arith.constant 0 : i32
    %c0_i32_1 = arith.constant 0 : i32
    return %c0_i32, %c0_i32_0 : i32, i32
  }
  func.func @transform_4(%arg0: i32) -> (i32, i32, i32) {
    %c0_i32 = arith.constant 0 : i32
    %c0_i32_0 = arith.constant 0 : i32
    %c0_i32_1 = arith.constant 0 : i32
    return %arg0, %c0_i32, %c0_i32_0 : i32, i32, i32
  }
}

</mosaic_0001>

<bundles_post_ra>
// kernel: tpu_custom_call.1
= control target key start
LH: loop header
LB: loop body
LE: loop exit
PB: predicated region body
PF: predicated region fallthrough
CT: control target
= control target key end

     0   :  { %s2467_s15 = smov 0   ;;  %s2625_s0 = inlined_call_operand.vmem [shape: f32[96,16], index: 0, kind: input, shape index: {}]   ;;  %s2626_s1 = inlined_call_operand.vmem [shape: f32[96,16], index: 1, kind: input, shape index: {}]   ;;  %s2627_s2 = inlined_call_operand.vmem [shape: f32[6,16], index: 2, kind: input, shape index: {}]   ;;  %s2628_s3 = inlined_call_operand.vmem [shape: f32[16,6], index: 3, kind: input, shape index: {}]   ;;  %s2629_s4 = inlined_call_operand.vmem [shape: f32[6,1,1], index: 4, kind: output, shape index: {}]  }
   0x1 LB: > { %s2032_s16 = sadd.s32 4294967295, %s2437_s15   ;;  %p2036_p0 = scmp.ge.s32.totalorder %s2437_s15, 1  ;;  %s2437_s15 = sphi %s2467_s15, %s14_s15  }
   0x2   : > { %p174_p1 = scmp.lt.s32.totalorder %s2437_s15, 3 }
   0x4   : > { %p175_p2 = pnand %p2036_p0, %p174_p1 }
   0x5   : > { %v234_v0 = vld [vmem:[%s2628_s3] sm:$0xff] (!%p175_p2)  ;;  %v235_v1 = vld [vmem:[%s2628_s3 + $0x8] sm:$0xff] (!%p175_p2)  ;;  %s204_s21 = smul.u32 (!%p175_p2), 6, %s2032_s16  ;;  %vm236_vm0 = vcmask (!%p175_p2), 130048   ;;  %v2439_v33 = vmov (!%p175_p2), 0.0|0.0   ;;  %vm2440_vm1 = vmmov (!%p175_p2), 0  }
   0x6   : > { %178 = sbr.rel (%p175_p2) target bundleno = 716 (0x2cc), region = 36  ;;  %v2343_v2 = vpack.c.bf16 (!%p175_p2), %v235_v1, %v234_v0  ;;  %v2441_v34 = vmov (!%p175_p2), 0.0   ;;  %v2530_v43 = vld [vmem:[%s2627_s2] sm:$0x3f] (!%p175_p2)  ;;  %vm1192_vm2 = vcmask (!%p175_p2), 46080   ;;  %vm1204_vm3 = vcmask (!%p175_p2), 0  }
   0x7   : > { %p205_p3 = scmp.lt.s32.totalorder (!%p175_p2), %s204_s21, 11  ;;  %s216_s5 = smul.u32 (!%p175_p2), 3, %s2032_s16 }
   0x8   : > { %2344 = vmatprep.subr.bf16.mxu0 (!%p175_p2), %v2343_v2  ;;  %2348 = vmatprep.subr.bf16.mxu1 (!%p175_p2), %v2343_v2 }
   0x9   : > { %2346 = vmatpush3.bf16.msra.mxu0 (!%p175_p2), %v2343_v2  ;;  %2350 = vmatpush3.bf16.msra.mxu1 (!%p175_p2), %v2343_v2  ;;  %p217_p4 = scmp.lt.s32.totalorder (!%p175_p2), %s216_s5, 5 }
   0xa   : > { %2352 = vmatprep.subr.bf16.mxu0 (!%p175_p2), %v2343_v2  ;;  %2356 = vmatprep.subr.bf16.mxu1 (!%p175_p2), %v2343_v2 }
   0xd   : > { %s2631_s21 = smov (!%p205_p3, %s204_s21), 11  ;;  %s2633_s5 = smov (!%p217_p4, %s216_s5), 5 }
   0xe   : > { %s2037_s22 = sshll.u32 %s2631_s21, 3  ;;  %s219_s8 = scalar_lea.vmem %s2629_s4, %s2633_s5 }
   0xf   : > { %s208_s25 = scalar_lea.vmem %s2625_s0, %s2037_s22  ;;  %s214_s28 = scalar_lea.vmem %s2626_s1, %s2037_s22 }
  0x10   : > { %v221_v3 = vld [vmem:[%s208_s25] sm:$0xff]  ;;  %v222_v5 = vld [vmem:[%s208_s25 + $0x8] sm:$0xff]  ;;  %v223_v7 = vld [vmem:[%s208_s25 + $0x10] sm:$0xff] }
  0x11   : > { %v227_v4 = vld [vmem:[%s214_s28] sm:$0xff]  ;;  %2177 = vmatprep.mubr.msk.f32.mxu0 %vm236_vm0, %v221_v3  ;;  %v228_v6 = vld [vmem:[%s214_s28 + $0x8] sm:$0xff]  ;;  %v229_v8 = vld [vmem:[%s214_s28 + $0x10] sm:$0xff]  ;;  %v463_v13 = vmul.f32 %v221_v3, %v221_v3  ;;  %v464_v17 = vmul.f32 %v222_v5, %v222_v5  ;;  %v465_v19 = vmul.f32 %v223_v7, %v223_v7 }
  0x12   : > { %2190 = vmatprep.mubr.msk.f32.mxu1 %vm236_vm0, %v227_v4  ;;  %2178 = vmatmul.mubr.msk.f32.vlgmr.msra.gmra.mrb[0].mxu0 %vm236_vm0, %v222_v5  ;;  %v224_v9 = vld [vmem:[%s208_s25 + $0x18] sm:$0xff]  ;;  %v225_v11 = vld [vmem:[%s208_s25 + $0x20] sm:$0xff]  ;;  %v582_v14 = vmul.f32 %v227_v4, %v227_v4  ;;  %v226_v15 = vld [vmem:[%s208_s25 + $0x28] sm:$0xff]  ;;  %v583_v18 = vmul.f32 %v228_v6, %v228_v6  ;;  %v584_v20 = vmul.f32 %v229_v8, %v229_v8 }
  0x13   : > { %2191 = vmatmul.mubr.msk.f32.vlgmr.msra.gmra.mrb[0].mxu1 %vm236_vm0, %v228_v6  ;;  %2354 = vmatpush3.bf16.msra.mxu0 %v2343_v2  ;;  %v230_v10 = vld [vmem:[%s214_s28 + $0x18] sm:$0xff]  ;;  %v231_v12 = vld [vmem:[%s214_s28 + $0x20] sm:$0xff]  ;;  %v232_v16 = vld [vmem:[%s214_s28 + $0x28] sm:$0xff]  ;;  %v466_v21 = vmul.f32 %v224_v9, %v224_v9  ;;  %v467_v23 = vmul.f32 %v225_v11, %v225_v11  ;;  %v468_v25 = vmul.f32 %v226_v15, %v226_v15 }
  0x14   : > { %2180 = vmatprep.mubr.msk.f32.mxu0 %vm236_vm0, %v223_v7  ;;  %2193 = vmatprep.mubr.msk.f32.mxu1 %vm236_vm0, %v229_v8  ;;  %v585_v22 = vmul.f32 %v230_v10, %v230_v10  ;;  %v586_v24 = vmul.f32 %v231_v12, %v231_v12  ;;  %v587_v26 = vmul.f32 %v232_v16, %v232_v16 }
  0x15   : > { %2358 = vmatpush3.bf16.msra.mxu1 %v2343_v2  ;;  %2360 = vmatprep.subr.bf16.mxu0 %v2343_v2  ;;  %v701_v27 = vmul.f32 %v227_v4, %v221_v3  ;;  %v702_v28 = vmul.f32 %v228_v6, %v222_v5  ;;  %v703_v29 = vmul.f32 %v229_v8, %v223_v7 }
  0x16   : > { %2181 = vmatmul.mubr.msk.f32.gmra.mrb[2].mxu0 %vm236_vm0, %v224_v9  ;;  %v704_v30 = vmul.f32 %v230_v10, %v224_v9  ;;  %v705_v31 = vmul.f32 %v231_v12, %v225_v11  ;;  %v706_v32 = vmul.f32 %v232_v16, %v226_v15  ;;  %2363 = vmatprep.subr.bf16.mxu1 %v2439_v33 }
  0x17   : > { %2194 = vmatmul.mubr.msk.f32.gmra.mrb[2].mxu1 %vm236_vm0, %v230_v10  ;;  %2183 = vmatprep.mubr.msk.f32.mxu0 %vm236_vm0, %v225_v11 }
  0x18   : > { %2196 = vmatprep.mubr.msk.f32.mxu1 %vm236_vm0, %v231_v12 }
  0x1a   : > { %2184 = vmatmul.mubr.msk.f32.gmra.mrb[4].mxu0 %vm236_vm0, %v226_v15 }
  0x1b   : > { %2197 = vmatmul.mubr.msk.f32.gmra.mrb[4].mxu1 %vm236_vm0, %v232_v16  ;;  %2203 = vmatprep.mubr.msk.f32.mxu0 %vm236_vm0, %v463_v13 }
  0x1c   : > { %2216 = vmatprep.mubr.msk.f32.mxu1 %vm236_vm0, %v582_v14 }
  0x1e   : > { %2204 = vmatmul.mubr.msk.f32.vlgmr.msra.gmra.mrb[6].mxu0 %vm236_vm0, %v464_v17 }
  0x1f   : > { %2217 = vmatmul.mubr.msk.f32.vlgmr.msra.gmra.mrb[6].mxu1 %vm236_vm0, %v583_v18  ;;  %2362 = vmatpush3.bf16.msra.mxu0 %v2343_v2 }
  0x20   : > { %2206 = vmatprep.mubr.msk.f32.mxu0 %vm236_vm0, %v465_v19  ;;  %2219 = vmatprep.mubr.msk.f32.mxu1 %vm236_vm0, %v584_v20 }
  0x21   : > { %2372 = vmatprep.subr.bf16.mxu0 %v2439_v33 }
  0x22   : > { %2207 = vmatmul.mubr.msk.f32.gmra.mrb[8].mxu0 %vm236_vm0, %v466_v21 }
  0x23   : > { %2220 = vmatmul.mubr.msk.f32.gmra.mrb[8].mxu1 %vm236_vm0, %v585_v22  ;;  %2209 = vmatprep.mubr.msk.f32.mxu0 %vm236_vm0, %v467_v23 }
  0x24   : > { %2222 = vmatprep.mubr.msk.f32.mxu1 %vm236_vm0, %v586_v24 }
  0x26   : > { %2210 = vmatmul.mubr.msk.f32.gmra.mrb[10].mxu0 %vm236_vm0, %v468_v25 }
  0x27   : > { %2223 = vmatmul.mubr.msk.f32.gmra.mrb[10].mxu1 %vm236_vm0, %v587_v26  ;;  %2229 = vmatprep.mubr.msk.f32.mxu0 %vm236_vm0, %v701_v27 }
  0x28   : > { %2242 = vmatprep.mubr.msk.f32.mxu1 %vm2440_vm1, %v2441_v34 }
  0x2a   : > { %2230 = vmatmul.mubr.msk.f32.vlgmr.msra.gmra.mrb[12].mxu0 %vm236_vm0, %v702_v28 }
  0x2b   : > { %2232 = vmatprep.mubr.msk.f32.mxu0 %vm236_vm0, %v703_v29 }
  0x2e   : > { %2233 = vmatmul.mubr.msk.f32.gmra.mrb[14].mxu0 %vm236_vm0, %v704_v30 }
  0x2f   : > { %2235 = vmatprep.mubr.msk.f32.mxu0 %vm236_vm0, %v705_v31 }
  0x32   : > { %2236 = vmatmul.mubr.msk.f32.gmra.mrb[16].mxu0 %vm236_vm0, %v706_v32 }
  0x33   : > { %2263 = vmatprep.mubr.msk.f32.mxu0 %vm2440_vm1, %v2441_v34 }
  0xe5   : > { %v2179_v35 = vpop.f32.mrb[0].mxu0 }
  0xe6   : > { %v2192_v36 = vpop.f32.mrb[0].mxu1  ;;  %v321_v37 = vpop.f32.mrb[1].mxu0 }
  0xe7   : > { %v434_v38 = vpop.f32.mrb[1].mxu1  ;;  %v2364_v39 = vpack.c.bf16 %v2179_v35, %v321_v37 }
  0xe8   : > { %v2367_v40 = vpack.c.bf16 %v2192_v36, %v434_v38 }
  0xe9   : > { %v2182_v41 = vpop.f32.mrb[2].mxu0  ;;  %2365 = vmatpush3.bf16.msra.mxu1 %v2364_v39 }
  0xea   : > { %v2525_v42 = vpop.f32.mrb[2].mxu1  ;;  %v331_v44 = vpop.f32.mrb[3].mxu0  ;;  %2366 = vmatprep.subr.bf16.mxu1 %v2439_v33 }
  0xeb   : > { %v444_v45 = vpop.f32.mrb[3].mxu1  ;;  %v2379_v46 = vpack.c.bf16 %v2182_v41, %v331_v44 }
  0xec   : > { %v2382_v47 = vpack.c.bf16 %v2525_v42, %v444_v45  ;;  %2243 = vmatmul.mubr.msk.f32.vlgmr.msra.gmra.mrb[12].mxu1 %vm236_vm0, %v2530_v43 }
  0xed   : > { %v2536_v48 = vpop.f32.mrb[4].mxu0  ;;  %2368 = vmatpush3.bf16.msra.mxu1 %v2367_v40  ;;  %2249 = vmatprep.mubr.msk.f32.mxu1 %vm2440_vm1, %v2441_v34 }
  0xee   : > { %v2538_v49 = vpop.f32.mrb[4].mxu1  ;;  %v2542_v50 = vpop.f32.mrb[5].mxu0  ;;  %2369 = vmatprep.subr.bf16.mxu1 %v2439_v33 }
  0xef   : > { %v454_v51 = vpop.f32.mrb[5].mxu1  ;;  %v2394_v52 = vpack.c.bf16 %v2536_v48, %v2542_v50 }
  0xf0   : > { %v2397_v53 = vpack.c.bf16 %v2538_v49, %v454_v51  ;;  %2250 = vmatmul.mubr.msk.f32.vlgmr.msra.gmra.mrb[14].mxu1 %vm236_vm0, %v2530_v43 }
  0xf1   : > { %v2205_v54 = vpop.f32.mrb[6].mxu0  ;;  %2256 = vmatprep.mubr.msk.f32.mxu1 %vm2440_vm1, %v2441_v34 }
  0xf2   : > { %v2218_v55 = vpop.f32.mrb[6].mxu1  ;;  %v553_v56 = vpop.f32.mrb[7].mxu0 }
  0xf3   : > { %v672_v57 = vpop.f32.mrb[7].mxu1  ;;  %v2370_v58 = vpack.c.bf16 %v2205_v54, %v553_v56 }
  0xf4   : > { %v2373_v59 = vpack.c.bf16 %v2218_v55, %v672_v57 }
  0xf5   : > { %v2208_v60 = vpop.f32.mrb[8].mxu0  ;;  %2371 = vmatpush3.bf16.msra.mxu1 %v2370_v58 }
  0xf6   : > { %2374 = vmatpush3.bf16.msra.mxu0 %v2373_v59  ;;  %v2221_v61 = vpop.f32.mrb[8].mxu1  ;;  %v563_v62 = vpop.f32.mrb[9].mxu0  ;;  %2375 = vmatprep.subr.bf16.mxu1 %v2439_v33 }
  0xf7   : > { %2378 = vmatprep.subr.bf16.mxu0 %v2439_v33  ;;  %v682_v63 = vpop.f32.mrb[9].mxu1  ;;  %v2385_v0 = vpack.c.bf16 %v2208_v60, %v563_v62 }
  0xf8   : > { %v2388_v1 = vpack.c.bf16 %v2221_v61, %v682_v63  ;;  %2257 = vmatmul.mubr.msk.f32.vlgmr.msra.gmra.mrb[16].mxu1 %vm236_vm0, %v2530_v43 }
  0xf9   : > { %2264 = vmatmul.mubr.msk.f32.vlgmr.msra.gmra.mrb[18].mxu0 %vm236_vm0, %v2530_v43  ;;  %v2211_v2 = vpop.f32.mrb[10].mxu0  ;;  %2270 = vmatprep.mubr.msk.f32.mxu1 %vm2440_vm1, %v2441_v34 }
  0xfa   : > { %2380 = vmatpush3.bf16.msra.mxu0 %v2379_v46  ;;  %2277 = vmatprep.mubr.msk.f32.mxu0 %vm2440_vm1, %v2441_v34  ;;  %v2224_v3 = vpop.f32.mrb[10].mxu1  ;;  %v573_v4 = vpop.f32.mrb[11].mxu0 }
  0xfb   : > { %2384 = vmatprep.subr.bf16.mxu0 %v2439_v33  ;;  %v692_v5 = vpop.f32.mrb[11].mxu1  ;;  %v2400_v6 = vpack.c.bf16 %v2211_v2, %v573_v4 }
  0xfc   : > { %v2403_v7 = vpack.c.bf16 %v2224_v3, %v692_v5 }
  0xfd   : > { %2278 = vmatmul.mubr.msk.f32.vlgmr.msra.gmra.mrb[20].mxu0 %vm236_vm0, %v2530_v43  ;;  %v2231_v8 = vpop.f32.mrb[12].mxu0 }
  0xfe   : > { %2386 = vmatpush3.bf16.msra.mxu0 %v2385_v0  ;;  %2291 = vmatprep.mubr.msk.f32.mxu0 %vm2440_vm1, %v2441_v34  ;;  %v791_v9 = vpop.f32.mrb[13].mxu0 }
  0xff   : > { %2390 = vmatprep.subr.bf16.mxu0 %v2439_v33  ;;  %v2376_v10 = vpack.c.bf16 %v2231_v8, %v791_v9 }
 0x101   : > { %2292 = vmatmul.mubr.msk.f32.vlgmr.msra.gmra.mrb[22].mxu0 %vm236_vm0, %v2530_v43  ;;  %v2234_v11 = vpop.f32.mrb[14].mxu0  ;;  %2377 = vmatpush3.bf16.msra.mxu1 %v2376_v10 }
 0x102   : > { %2305 = vmatprep.mubr.msk.f32.mxu0 %vm2440_vm1, %v2441_v34  ;;  %v801_v12 = vpop.f32.mrb[15].mxu0  ;;  %2381 = vmatprep.subr.bf16.mxu1 %v2439_v33 }
 0x103   : > { %v2391_v13 = vpack.c.bf16 %v2234_v11, %v801_v12 }
 0x104   : > { %2271 = vmatmul.mubr.msk.f32.vlgmr.msra.gmra.mrb[18].mxu1 %vm236_vm0, %v2530_v43 }
 0x105   : > { %2383 = vmatpush3.bf16.msra.mxu1 %v2382_v47  ;;  %2392 = vmatpush3.bf16.msra.mxu0 %v2391_v13  ;;  %v2237_v14 = vpop.f32.mrb[16].mxu0 }
 0x106   : > { %2284 = vmatprep.mubr.msk.f32.mxu1 %vm2440_vm1, %v2441_v34  ;;  %2387 = vmatprep.subr.bf16.mxu1 %v2439_v33  ;;  %v811_v15 = vpop.f32.mrb[17].mxu0 }
 0x107   : > { %2396 = vmatprep.subr.bf16.mxu0 %v2439_v33  ;;  %v2406_v16 = vpack.c.bf16 %v2237_v14, %v811_v15 }
 0x108   : > { %2285 = vmatmul.mubr.msk.f32.vlgmr.msra.gmra.mrb[20].mxu1 %vm236_vm0, %v2530_v43  ;;  %2306 = vmatmul.mubr.msk.f32.vlgmr.msra.gmra.mrb[24].mxu0 %vm236_vm0, %v2530_v43 }
 0x109   : > { %2389 = vmatpush3.bf16.msra.mxu1 %v2388_v1  ;;  %2398 = vmatpush3.bf16.msra.mxu0 %v2397_v53 }
 0x10a   : > { %2298 = vmatprep.mubr.msk.f32.mxu1 %vm2440_vm1, %v2441_v34  ;;  %2393 = vmatprep.subr.bf16.mxu1 %v2439_v33 }
 0x10b   : > { %2319 = vmatprep.mubr.msk.f32.mxu0 %vm2440_vm1, %v2441_v34  ;;  %2402 = vmatprep.subr.bf16.mxu0 %v2439_v33 }
 0x10c   : > { %2299 = vmatmul.mubr.msk.f32.vlgmr.msra.gmra.mrb[22].mxu1 %vm236_vm0, %v2530_v43  ;;  %2320 = vmatmul.mubr.msk.f32.vlgmr.msra.gmra.mrb[26].mxu0 %vm236_vm0, %v2530_v43 }
 0x10d   : > { %2395 = vmatpush3.bf16.msra.mxu1 %v2394_v52  ;;  %2312 = vmatprep.mubr.msk.f32.mxu1 %vm2440_vm1, %v2441_v34 }
 0x10e   : > { %2399 = vmatprep.subr.bf16.mxu1 %v2439_v33  ;;  %2404 = vmatpush3.bf16.msra.mxu0 %v2403_v7 }
 0x10f   : > { %2333 = vmatprep.mubr.msk.f32.mxu0 %vm2440_vm1, %v2441_v34 }
 0x110   : > { %2313 = vmatmul.mubr.msk.f32.vlgmr.msra.gmra.mrb[24].mxu1 %vm236_vm0, %v2530_v43 }
 0x111   : > { %2401 = vmatpush3.bf16.msra.mxu1 %v2400_v6  ;;  %2326 = vmatprep.mubr.msk.f32.mxu1 %vm2440_vm1, %v2441_v34 }
 0x112   : > { %2334 = vmatmul.mubr.msk.f32.vlgmr.msra.gmra.mrb[28].mxu0 %vm236_vm0, %v2530_v43  ;;  %2405 = vmatprep.subr.bf16.mxu1 %v2439_v33 }
 0x114   : > { %2327 = vmatmul.mubr.msk.f32.vlgmr.msra.gmra.mrb[26].mxu1 %vm236_vm0, %v2530_v43 }
 0x115   : > { %2407 = vmatpush3.bf16.msra.mxu1 %v2406_v16  ;;  %2340 = vmatprep.mubr.msk.f32.mxu1 %vm2440_vm1, %v2441_v34 }
 0x118   : > { %2341 = vmatmul.mubr.msk.f32.vlgmr.msra.gmra.mrb[28].mxu1 %vm236_vm0, %v2530_v43 }
 0x1bf   : > { %v889_v17 = vpop.f32.mrb[12].mxu1 }
 0x1c0   : > { %v2244_v18 = vpop.f32.mrb[13].mxu1  ;;  %v1173_v20 = vmul.f32 %v889_v17, %v889_v17 }
 0x1c3   : > { %v959_v19 = vpop.f32.mrb[14].mxu1 }
 0x1c4   : > { %v1174_v21 = vmul.f32 %v959_v19, %v959_v19  ;;  %v1175_v22 = vmul.f32 %v959_v19, %v889_v17  ;;  %v2251_v23 = vpop.f32.mrb[15].mxu1 }
 0x1c6   : > { %v1185_v24 = vadd.f32 %v1174_v21, %v1173_v20  ;;  %v1179_v45 = vmul.f32 2.0, %v1175_v22 }
 0x1c8   : > { %v1186_v31 = vadd.f32 0.0001, %v1185_v24  ;;  %v1180_v56 = vadd.f32 0.0001, %v1179_v45 }
 0x1cb   : > { %v1029_v25 = vpop.f32.mrb[16].mxu1 }
 0x1cc   : > { %v1099_v26 = vpop.f32.mrb[18].mxu0  ;;  %v1176_v27 = vsub.f32 %v1029_v25, %v1173_v20  ;;  %v2258_v29 = vpop.f32.mrb[17].mxu1 }
 0x1cd   : > { %v1177_v28 = vsub.f32 %v1099_v26, %v1174_v21  ;;  %v2265_v30 = vpop.f32.mrb[19].mxu0 }
 0x1cf   : > { %v1187_v32 = vadd.f32 %v1177_v28, %v1176_v27 }
 0x1d0   : > { %v1272_v33 = vpop.f32.mrb[20].mxu0 }
 0x1d1   : > { %v1188_v34 = vadd.f32 0.0009, %v1187_v32  ;;  %v1556_v35 = vmul.f32 %v1272_v33, %v1272_v33  ;;  %v2279_v36 = vpop.f32.mrb[21].mxu0 }
 0x1d3   : > { %v1189_v37 = vmul.f32 %v1188_v34, %v1186_v31 }
 0x1d4   : > { %v1412_v38 = vpop.f32.mrb[22].mxu0 }
 0x1d5   : > { %v1559_v39 = vsub.f32 %v1412_v38, %v1556_v35  ;;  %v2293_v40 = vpop.f32.mrb[23].mxu0  ;;  %2425 = vrcp.f32 %v1189_v37 }
 0x1d7   : > { %v1169_v41 = vpop.f32.mrb[18].mxu1 }
 0x1d8   : > { %v1178_v42 = vsub.f32 %v1169_v41, %v1175_v22  ;;  %v2272_v43 = vpop.f32.mrb[19].mxu1 }
 0x1da   : > { %v1181_v44 = vmul.f32 2.0, %v1178_v42 }
 0x1db   : > { %v1342_v46 = vpop.f32.mrb[20].mxu1  ;;  %v1552_v47 = vpop.f32.mrb[24].mxu0 }
 0x1dc   : > { %v1182_v48 = vadd.f32 0.0009, %v1181_v44  ;;  %v1557_v49 = vmul.f32 %v1342_v46, %v1342_v46  ;;  %v1558_v50 = vmul.f32 %v1342_v46, %v1272_v33  ;;  %v2286_v51 = vpop.f32.mrb[21].mxu1  ;;  %v2307_v52 = vpop.f32.mrb[25].mxu0 }
 0x1de   : > { %v1183_v53 = vmax.f32 %v1182_v48, 0.0  ;;  %v1568_v54 = vadd.f32 %v1557_v49, %v1556_v35  ;;  %v1561_v55 = vsub.f32 %v1552_v47, %v1558_v50  ;;  %v1562_v57 = vmul.f32 2.0, %v1558_v50 }
 0x1df   : > { %v1482_v58 = vpop.f32.mrb[22].mxu1  ;;  %v1724_v59 = vpop.f32.mrb[26].mxu0 }
 0x1e0   : > { %v1564_v60 = vmul.f32 2.0, %v1561_v55  ;;  %v1560_v61 = vsub.f32 %v1482_v58, %v1557_v49  ;;  %v2300_v62 = vpop.f32.mrb[23].mxu1  ;;  %v2321_v63 = vpop.f32.mrb[27].mxu0  ;;  %v1184_v0 = vmul.f32 %v1183_v53, %v1180_v56  ;;  %v1939_v4 = vmul.f32 %v1724_v59, %v1724_v59 }
 0x1e1   : > { %v2426_v1 = vpop.eup %2425  ;;  %v1563_v5 = vadd.f32 0.0001, %v1562_v57  ;;  %v1569_v6 = vadd.f32 0.0001, %v1568_v54 }
 0x1e2   : > { %v1565_v2 = vadd.f32 0.0009, %v1564_v60  ;;  %v1570_v3 = vadd.f32 %v1560_v61, %v1559_v39  ;;  %v1191_v8 = vmul.f32 %v2426_v1, %v1184_v0 }
 0x1e3   : > { %v1654_v7 = vpop.f32.mrb[24].mxu1 }
 0x1e4   : > { %v1566_v9 = vmax.f32 %v1565_v2, 0.0  ;;  %v1571_v10 = vadd.f32 0.0009, %v1570_v3  ;;  %v1938_v11 = vmul.f32 %v1654_v7, %v1654_v7  ;;  %v1940_v12 = vmul.f32 %v1724_v59, %v1654_v7  ;;  %v2314_v13 = vpop.f32.mrb[25].mxu1 }
 0x1e5   : > { %v1193_v14 = vsel %vm1192_vm2, %v1191_v8, 0.0  ;;  %v1864_v15 = vpop.f32.mrb[28].mxu0 }
 0x1e6   : > { %v1567_v16 = vmul.f32 %v1566_v9, %v1563_v5  ;;  %v1572_v17 = vmul.f32 %v1571_v10, %v1569_v6  ;;  %v1950_v18 = vadd.f32 %v1939_v4, %v1938_v11  ;;  %1194 = vadd.xlane.f32.xlu0 %v1193_v14  ;;  %v2335_v19 = vpop.f32.mrb[29].mxu0  ;;  %v1942_v20 = vsub.f32 %v1864_v15, %v1939_v4 }
 0x1e7   : > { %v1794_v21 = vpop.f32.mrb[26].mxu1  ;;  %v1944_v30 = vmul.f32 2.0, %v1940_v12 }
 0x1e8   : > { %2427 = vrcp.f32 %v1572_v17  ;;  %v1941_v22 = vsub.f32 %v1794_v21, %v1938_v11  ;;  %v2328_v23 = vpop.f32.mrb[27].mxu1  ;;  %v1951_v26 = vadd.f32 0.0001, %v1950_v18 }
 0x1e9   : > { %v1945_v35 = vadd.f32 0.0001, %v1944_v30 }
 0x1ea   : > { %v1952_v24 = vadd.f32 %v1942_v20, %v1941_v22 }
 0x1eb   : > { %v1934_v25 = vpop.f32.mrb[28].mxu1 }
 0x1ec   : > { %v1953_v27 = vadd.f32 0.0009, %v1952_v24  ;;  %v1943_v28 = vsub.f32 %v1934_v25, %v1940_v12  ;;  %v2342_v29 = vpop.f32.mrb[29].mxu1 }
 0x1ee   : > { %v1954_v31 = vmul.f32 %v1953_v27, %v1951_v26  ;;  %v1946_v32 = vmul.f32 2.0, %v1943_v28 }
 0x1f0   : > { %2429 = vrcp.f32 %v1954_v31  ;;  %v1947_v33 = vadd.f32 0.0009, %v1946_v32 }
 0x1f2   : > { %v2428_v34 = vpop.eup %2427  ;;  %v1948_v36 = vmax.f32 %v1947_v33, 0.0 }
 0x1f3   : > { %v1574_v37 = vmul.f32 %v2428_v34, %v1567_v16 }
 0x1f4   : > { %v1949_v38 = vmul.f32 %v1948_v36, %v1945_v35 }
 0x1f5   : > { %v1575_v39 = vsel %vm1192_vm2, %v1574_v37, 0.0 }
 0x1f6   : > { %1576 = vadd.xlane.f32.xlu0 %v1575_v39 }
 0x1fa   : > { %v2430_v40 = vpop.eup %2429 }
 0x1fb   : > { %v1956_v41 = vmul.f32 %v2430_v40, %v1949_v38 }
 0x1fd   : > { %v1957_v42 = vsel %vm1192_vm2, %v1956_v41, 0.0 }
 0x1fe   : > { %1958 = vadd.xlane.f32.xlu1 %v1957_v42 }
 0x273   : > { %v1195_v43 = vpop.xlane.xlu0 %1194 }
 0x274   : > { %v1196_v44 = vrot.slane %v1195_v43, 4 }
 0x276   : > { %v1197_v45 = vadd.f32 %v1196_v44, %v1195_v43 }
 0x278   : > { %v1198_v46 = vrot.slane %v1197_v45, 2 }
 0x27a   : > { %v1199_v47 = vadd.f32 %v1198_v46, %v1197_v45 }
 0x27c   : > { %v1200_v48 = vrot.slane %v1199_v47, 1 }
 0x27e   : > { %v1201_v49 = vadd.f32 %v1200_v48, %v1199_v47 }
 0x280   : > { %2408 = vpush %v1201_v49 }
 0x283   : > { %v1577_v50 = vpop.xlane.xlu0 %1576 }
 0x284   : > { %v1578_v51 = vrot.slane %v1577_v50, 4 }
 0x286   : > { %v1579_v52 = vadd.f32 %v1578_v51, %v1577_v50 }
 0x288   : > { %v1580_v53 = vrot.slane %v1579_v52, 2 }
 0x28a   : > { %v1581_v54 = vadd.f32 %v1580_v53, %v1579_v52 }
 0x28b   : > { %v1959_v55 = vpop.xlane.xlu1 %1958 }
 0x28c   : > { %v1960_v56 = vrot.slane %v1959_v55, 4  ;;  %v1582_v57 = vrot.slane %v1581_v54, 1 }
 0x28e   : > { %v1961_v58 = vadd.f32 %v1960_v56, %v1959_v55  ;;  %v1583_v59 = vadd.f32 %v1582_v57, %v1581_v54 }
 0x290   : > { %v1962_v60 = vrot.slane %v1961_v58, 2  ;;  %2410 = vpush %v1583_v59 }
 0x292   : > { %v1963_v61 = vadd.f32 %v1962_v60, %v1961_v58 }
 0x294   : > { %v1964_v62 = vrot.slane %v1963_v61, 1 }
 0x296   : > { %v1965_v63 = vadd.f32 %v1964_v62, %v1963_v61 }
 0x298   : > { %2412 = vpush %v1965_v63 }
 0x2b1   : > { %s2409_s9 = spop %2408 }
 0x2b2   : > { %v1203_v0 = vstv %s2409_s9 }
 0x2b3   : > { %1205 = vst.msk [vmem:[%s219_s8] sm:$0x1] %vm1204_vm3, %v1203_v0 }
 0x2c1   : > { %s2411_s10 = spop %2410 }
 0x2c2   : > { %v1585_v1 = vstv %s2411_s10 }
 0x2c3   : > { %2079 = vst.msk [vmem:[%s219_s8 + $0x1] sm:$0x1] %vm1204_vm3, %v1585_v1 }
 0x2c9   : > { %s2413_s11 = spop %2412 }
 0x2ca   : > { %v1967_v2 = vstv %s2413_s11 }
 0x2cb   : > { %2085 = vst.msk [vmem:[%s219_s8 + $0x2] sm:$0x1] %vm1204_vm3, %v1967_v2 }
 0x2cc PF: > { %s14_s15 = sadd.s32 1, %s2437_s15  }
 0x2cd   : > { %p11_p5 = scmp.ge.s32.totalorder %s14_s15, 4  }
 0x2cf   :  { %13 = sbr.rel (!%p11_p5) target bundleno = 1 (0x1), region = 71 }

</bundles_post_ra>
